<compile_context>
chip_gen: v5e
topology: v5e:2x2
jax: 0.10.0
libtpu: 0.0.40
codegen_flags: <defaults>
</compile_context>

<pallas_src>
import functools

import jax
import jax.numpy as jnp
from jax.experimental import pallas as pl
from jax.experimental.pallas import tpu as pltpu


def _round_up(x, m):
    return (x + m - 1) // m * m


def _spgat_attn_kernel(f1_ref, f2_ref, adj_ref, h_ref, out_ref, *, alpha, fout, concat):
    """One (row-tile, col-tile) step of masked attention with online accumulation.

    f1_ref : (tm, 1)   f32   a[:, :F] . h[i]   for the row tile
    f2_ref : (1, tn)   f32   a[:, F:] . h[j]   for the col tile (pre-transposed)
    adj_ref: (tm, tn)  int8  0/1 adjacency mask tile
    h_ref  : (tn, Fp)  bf16  [h | 1 | 0-pad] rows of the col tile
    out_ref: (tm, Fp)  f32   resident accumulator -> final output block
    """
    j = pl.program_id(1)

    @pl.when(j == 0)
    def _():
        out_ref[...] = jnp.zeros_like(out_ref)

    # s[i,j] = f1[i] + f2[j];  edge_e = exp(-leakyrelu(s)) with the negation
    # fused into the select (one VALU select + one EUP exp per edge).
    s = f1_ref[...] + f2_ref[...]                                   # (tm, tn)
    edge_e = jnp.exp(jnp.where(s > 0.0, -s, (-alpha) * s))
    e = (edge_e * adj_ref[...].astype(jnp.float32)).astype(jnp.bfloat16)

    # e @ [h | 1] accumulates numerator and row-sum in a single MXU pass.
    out_ref[...] += jnp.dot(e, h_ref[...], preferred_element_type=jnp.float32)

    @pl.when(j == pl.num_programs(1) - 1)
    def _():
        acc = out_ref[...]
        den = acc[:, fout:fout + 1]            # folded row-sum column
        # NOTE: rows with no edges give 0/0 = NaN, exactly like the PyTorch
        # module (self-loops in adj are expected).
        h_prime = acc / den
        if concat:
            h_prime = jnp.where(h_prime > 0.0, h_prime, jnp.exp(h_prime) - 1.0)
        out_ref[...] = h_prime


def sp_graph_attention_layer(x, adj, W, a, *, alpha, concat=True,
                             block_m=256, block_n=512):
    """Pallas forward pass of SpGraphAttentionLayer.

    x:   (N, in_features)
    adj: (N, N) adjacency (nonzero => edge)
    W:   (in_features, out_features)
    a:   (1, 2 * out_features)
    """
    N = x.shape[0]
    fout = W.shape[1]

    x = x.astype(jnp.float32)
    W = W.astype(jnp.float32)
    a = a.astype(jnp.float32)

    # Hoisted dense projections (cheap O(N*F); done once, outside the N^2 kernel).
    h = x @ W                                   # (N, Fout)
    f1 = h @ a[:, :fout].T                      # (N, 1)
    f2 = (h @ a[:, fout:].T).T                  # (1, N), lane-contiguous

    # Tile sizes: rows multiple of 8, cols multiple of 128 (TPU tiling rules).
    tm = min(_round_up(block_m, 8), _round_up(N, 8))
    tn = min(_round_up(block_n, 128), _round_up(N, 128))
    Nm = _round_up(N, tm)                       # padded query rows
    Nn = _round_up(N, tn)                       # padded neighbor cols
    fpad = _round_up(fout + 1, 128)             # lane-dense width (+1 ones column)

    # Padded / packed operands. Padding edges are mask==0, so they contribute 0.
    adj_p = jnp.zeros((Nm, Nn), jnp.int8).at[:N, :N].set((adj != 0).astype(jnp.int8))
    f1_p = jnp.zeros((Nm, 1), jnp.float32).at[:N, :].set(f1)
    f2_p = jnp.zeros((1, Nn), jnp.float32).at[:, :N].set(f2)
    h_aug = jnp.zeros((Nn, fpad), jnp.float32)
    h_aug = h_aug.at[:N, :fout].set(h)
    h_aug = h_aug.at[:N, fout].set(1.0)         # ones column -> folded row-sum
    h_aug = h_aug.astype(jnp.bfloat16)

    grid = (Nm // tm, Nn // tn)
    kernel = functools.partial(_spgat_attn_kernel, alpha=float(alpha),
                               fout=int(fout), concat=bool(concat))

    out_p = pl.pallas_call(
        kernel,
        out_shape=jax.ShapeDtypeStruct((Nm, fpad), jnp.float32),
        grid_spec=pltpu.PrefetchScalarGridSpec(
            num_scalar_prefetch=0,
            grid=grid,
            in_specs=[
                pl.BlockSpec((tm, 1), lambda i, j: (i, 0)),      # f1
                pl.BlockSpec((1, tn), lambda i, j: (0, j)),      # f2 row
                pl.BlockSpec((tm, tn), lambda i, j: (i, j)),     # adj mask (int8)
                pl.BlockSpec((tn, fpad), lambda i, j: (j, 0)),   # [h | 1] (bf16)
            ],
            out_specs=pl.BlockSpec((tm, fpad), lambda i, j: (i, 0)),
        ),
        compiler_params=pltpu.CompilerParams(
            dimension_semantics=("parallel", "arbitrary")),
    )(f1_p, f2_p, adj_p, h_aug)

    return out_p[:N, :fout]


def _reference(x, adj, W, a, alpha, concat=True):
    """Pure-JAX f32 reference of the same dense-masked math (for sanity checking)."""
    fout = W.shape[1]
    h = x @ W
    f1 = h @ a[:, :fout].T
    f2 = h @ a[:, fout:].T
    s = f1 + f2.T
    e = jnp.where(adj != 0, jnp.exp(-jnp.where(s > 0, s, alpha * s)), 0.0)
    rowsum = e.sum(axis=1, keepdims=True)
    h_prime = (e @ h) / rowsum
    return jnp.where(h_prime > 0, h_prime, jnp.exp(h_prime) - 1.0) if concat else h_prime


if __name__ == "__main__":
    # Small deterministic example consistent with the module's forward:
    # input (N, in_features), adj (N, N).
    N, FIN, FOUT = 256, 16, 32
    alpha = 0.2

    key = jax.random.PRNGKey(0)
    kx, kadj, kw, ka, kx2, kadj2 = jax.random.split(key, 6)

    # Deterministic xavier_normal_ init (gain=1.414), as in the module __init__.
    gain = 1.414
    w_std = gain * (2.0 / (FIN + FOUT)) ** 0.5
    a_std = gain * (2.0 / (1 + 2 * FOUT)) ** 0.5
    W = w_std * jax.random.normal(kw, (FIN, FOUT), dtype=jnp.float32)
    a = a_std * jax.random.normal(ka, (1, 2 * FOUT), dtype=jnp.float32)

    x = jax.random.normal(kx, (N, FIN), dtype=jnp.float32)
    adj = jax.random.bernoulli(kadj, p=0.1, shape=(N, N)).astype(jnp.float32)
    adj = jnp.maximum(adj, jnp.eye(N, dtype=jnp.float32))   # self-loops: no empty rows

    # bf16 MXU operands -> compare against the f32 reference at bf16-level tolerance.
    TOL = 2e-2

    # Test 1: concat=True, 128x128 tiles -> 2x2 grid exercises the online accumulation.
    out = sp_graph_attention_layer(x, adj, W, a, alpha=alpha, concat=True,
                                   block_m=128, block_n=128)
    out = jax.block_until_ready(out)
    ref = _reference(x, adj, W, a, alpha, concat=True)
    assert out.shape == (N, FOUT)
    assert jnp.allclose(out, ref, atol=TOL, rtol=TOL), float(jnp.max(jnp.abs(out - ref)))

    # Test 2: N not divisible by the tiles (padding path) and concat=False.
    N2 = 200
    x2 = jax.random.normal(kx2, (N2, FIN), dtype=jnp.float32)
    adj2 = jax.random.bernoulli(kadj2, p=0.15, shape=(N2, N2)).astype(jnp.float32)
    adj2 = jnp.maximum(adj2, jnp.eye(N2, dtype=jnp.float32))
    out2 = sp_graph_attention_layer(x2, adj2, W, a, alpha=alpha, concat=False,
                                    block_m=128, block_n=128)
    out2 = jax.block_until_ready(out2)
    ref2 = _reference(x2, adj2, W, a, alpha, concat=False)
    assert out2.shape == (N2, FOUT)
    assert jnp.allclose(out2, ref2, atol=TOL, rtol=TOL), float(jnp.max(jnp.abs(out2 - ref2)))

    print("KERNEL_OK")
</pallas_src>

<mosaic_0001>
module attributes {stable_mosaic.version = 11 : i64} {
  func.func @_spgat_attn_kernel(%arg0: i32, %arg1: i32, %arg2: memref<128x1xf32, #tpu.memory_space<vmem>>, %arg3: memref<1x128xf32, #tpu.memory_space<vmem>>, %arg4: memref<128x128xi8, #tpu.memory_space<vmem>>, %arg5: memref<128x128xbf16, #tpu.memory_space<vmem>>, %arg6: memref<128x128xf32, #tpu.memory_space<vmem>>) attributes {dimension_semantics = [#tpu.dimension_semantics<parallel>, #tpu.dimension_semantics<arbitrary>], iteration_bounds = array<i64: 2, 2>, scalar_prefetch = 0 : i64, scratch_operands = 0 : i64, tpu.core_type = #tpu.core_type<tc>, window_params = [{transform_indices = @transform_0, window_bounds = array<i64: 128, 1>}, {transform_indices = @transform_1, window_bounds = array<i64: 1, 128>}, {transform_indices = @transform_2, window_bounds = array<i64: 128, 128>}, {transform_indices = @transform_3, window_bounds = array<i64: 128, 128>}, {transform_indices = @transform_4, window_bounds = array<i64: 128, 128>}]} {
    %c0_i32 = arith.constant 0 : i32
    %0 = arith.cmpi eq, %arg1, %c0_i32 : i32
    %1 = arith.extui %0 : i1 to i32
    %c0_i32_0 = arith.constant 0 : i32
    %2 = arith.cmpi ne, %1, %c0_i32_0 : i32
    scf.if %2 {
      %cst_16 = arith.constant 0.000000e+00 : f32
      %28 = vector.broadcast %cst_16 : f32 to vector<128x128xf32>
      %c0_17 = arith.constant 0 : index
      %c0_18 = arith.constant 0 : index
      %29 = vector.load %arg6[%c0_17, %c0_18] : memref<128x128xf32, #tpu.memory_space<vmem>>, vector<128x128xf32>
      tpu.vector_store %arg6[%c0_17, %c0_18], %28 {strides = array<i32>} : memref<128x128xf32, #tpu.memory_space<vmem>>, vector<128x128xf32>,
    } else {
    }
    %c0 = arith.constant 0 : index
    %c0_1 = arith.constant 0 : index
    %3 = vector.load %arg2[%c0, %c0_1] : memref<128x1xf32, #tpu.memory_space<vmem>>, vector<128x1xf32>
    %c0_2 = arith.constant 0 : index
    %c0_3 = arith.constant 0 : index
    %4 = vector.load %arg3[%c0_2, %c0_3] : memref<1x128xf32, #tpu.memory_space<vmem>>, vector<1x128xf32>
    %5 = vector.broadcast %3 : vector<128x1xf32> to vector<128x128xf32>
    %6 = vector.broadcast %4 : vector<1x128xf32> to vector<128x128xf32>
    %7 = arith.addf %5, %6 : vector<128x128xf32>
    %cst = arith.constant 0.000000e+00 : f32
    %8 = vector.broadcast %cst : f32 to vector<128x128xf32>
    %9 = arith.cmpf ogt, %7, %8 : vector<128x128xf32>
    %cst_4 = arith.constant 0.000000e+00 : f32
    %10 = vector.broadcast %cst_4 : f32 to vector<128x128xf32>
    %11 = arith.subf %10, %7 : vector<128x128xf32>
    %cst_5 = arith.constant -2.000000e-01 : f32
    %12 = vector.broadcast %cst_5 : f32 to vector<128x128xf32>
    %13 = arith.mulf %12, %7 : vector<128x128xf32>
    %14 = arith.select %9, %11, %13 : vector<128x128xi1>, vector<128x128xf32>
    %15 = math.exp %14 : vector<128x128xf32>
    %c0_6 = arith.constant 0 : index
    %c0_7 = arith.constant 0 : index
    %16 = vector.load %arg4[%c0_6, %c0_7] : memref<128x128xi8, #tpu.memory_space<vmem>>, vector<128x128xi8>
    %17 = arith.sitofp %16 : vector<128x128xi8> to vector<128x128xf32>
    %18 = arith.mulf %15, %17 : vector<128x128xf32>
    %19 = arith.truncf %18 : vector<128x128xf32> to vector<128x128xbf16>
    %c0_8 = arith.constant 0 : index
    %c0_9 = arith.constant 0 : index
    %20 = vector.load %arg6[%c0_8, %c0_9] : memref<128x128xf32, #tpu.memory_space<vmem>>, vector<128x128xf32>
    %c0_10 = arith.constant 0 : index
    %c0_11 = arith.constant 0 : index
    %21 = vector.load %arg5[%c0_10, %c0_11] : memref<128x128xbf16, #tpu.memory_space<vmem>>, vector<128x128xbf16>
    %cst_12 = arith.constant dense<0.000000e+00> : vector<128x128xf32>
    %22 = tpu.matmul %19, %21, %cst_12 {dimension_numbers = #tpu.dot_dimension_numbers<[1], [0], [0], [1], [0, 0, 1, 1], [], []>} : vector<128x128xbf16>, vector<128x128xbf16>, vector<128x128xf32> -> vector<128x128xf32>
    %23 = arith.addf %20, %22 : vector<128x128xf32>
    %c0_13 = arith.constant 0 : index
    %c0_14 = arith.constant 0 : index
    %24 = vector.load %arg6[%c0_13, %c0_14] : memref<128x128xf32, #tpu.memory_space<vmem>>, vector<128x128xf32>
    tpu.vector_store %arg6[%c0_13, %c0_14], %23 {strides = array<i32>} : memref<128x128xf32, #tpu.memory_space<vmem>>, vector<128x128xf32>,
    %c1_i32 = arith.constant 1 : i32
    %25 = arith.cmpi eq, %arg1, %c1_i32 : i32
    %26 = arith.extui %25 : i1 to i32
    %c0_i32_15 = arith.constant 0 : i32
    %27 = arith.cmpi ne, %26, %c0_i32_15 : i32
    scf.if %27 {
      %c0_16 = arith.constant 0 : index
      %c0_17 = arith.constant 0 : index
      %28 = vector.load %arg6[%c0_16, %c0_17] : memref<128x128xf32, #tpu.memory_space<vmem>>, vector<128x128xf32>
      %29 = vector.extract_strided_slice %28 {offsets = [0, 32], sizes = [128, 1], strides = [1, 1]} : vector<128x128xf32> to vector<128x1xf32>
      %30 = vector.broadcast %29 : vector<128x1xf32> to vector<128x128xf32>
      %31 = arith.divf %28, %30 : vector<128x128xf32>
      %cst_18 = arith.constant 0.000000e+00 : f32
      %32 = vector.broadcast %cst_18 : f32 to vector<128x128xf32>
      %33 = arith.cmpf ogt, %31, %32 : vector<128x128xf32>
      %34 = math.exp %31 : vector<128x128xf32>
      %cst_19 = arith.constant 1.000000e+00 : f32
      %35 = vector.broadcast %cst_19 : f32 to vector<128x128xf32>
      %36 = arith.subf %34, %35 : vector<128x128xf32>
      %37 = arith.select %33, %31, %36 : vector<128x128xi1>, vector<128x128xf32>
      %c0_20 = arith.constant 0 : index
      %c0_21 = arith.constant 0 : index
      %38 = vector.load %arg6[%c0_20, %c0_21] : memref<128x128xf32, #tpu.memory_space<vmem>>, vector<128x128xf32>
      tpu.vector_store %arg6[%c0_20, %c0_21], %37 {strides = array<i32>} : memref<128x128xf32, #tpu.memory_space<vmem>>, vector<128x128xf32>,
    } else {
    }
    return
  }
  func.func @transform_0(%arg0: i32, %arg1: i32) -> (i32, i32) {
    %c0_i32 = arith.constant 0 : i32
    %c0_i32_0 = arith.constant 0 : i32
    return %arg0, %c0_i32 : i32, i32
  }
  func.func @transform_1(%arg0: i32, %arg1: i32) -> (i32, i32) {
    %c0_i32 = arith.constant 0 : i32
    %c0_i32_0 = arith.constant 0 : i32
    return %c0_i32, %arg1 : i32, i32
  }
  func.func @transform_2(%arg0: i32, %arg1: i32) -> (i32, i32) {
    %c0_i32 = arith.constant 0 : i32
    return %arg0, %arg1 : i32, i32
  }
  func.func @transform_3(%arg0: i32, %arg1: i32) -> (i32, i32) {
    %c0_i32 = arith.constant 0 : i32
    %c0_i32_0 = arith.constant 0 : i32
    return %arg1, %c0_i32 : i32, i32
  }
  func.func @transform_4(%arg0: i32, %arg1: i32) -> (i32, i32) {
    %c0_i32 = arith.constant 0 : i32
    %c0_i32_0 = arith.constant 0 : i32
    return %arg0, %c0_i32 : i32, i32
  }
}

</mosaic_0001>

<bundles_post_ra>
// kernel: tpu_custom_call.1
= control target key start
LH: loop header
LB: loop body
LE: loop exit
PB: predicated region body
PF: predicated region fallthrough
CT: control target
= control target key end

     0   :  { %s2387_s0 = inlined_call_operand.vmem [shape: f32[256,1], index: 0, kind: input, shape index: {}]   ;;  %s2388_s1 = inlined_call_operand.vmem [shape: f32[1,256], index: 1, kind: input, shape index: {}]   ;;  %s2389_s2 = inlined_call_operand.vmem [shape: s8[256,256], index: 2, kind: input, shape index: {}]   ;;  %s2390_s3 = inlined_call_operand.vmem [shape: bf16[256,128], index: 3, kind: input, shape index: {}]   ;;  %s2391_s4 = inlined_call_operand.hbm [shape: f32[256,128], index: 4, kind: output, shape index: {}]  }
   0x1   :  { %2398 = sst [smem:[#allocation12_spill]] %s2389_s2 }
   0x2   :  { %9 = vsyncpa [#allocation4], 0 }
   0x3   :  { %11 = vsyncpa [#allocation4 + $0x1], 0  ;;  %s1780_s15 = smov 0   ;;  %s1782_s16 = smov 0  }
   0x4   :  { %s1784_s17 = smov 0   ;;  %s1786_s18 = smov 0  }
   0x5   :  { %s1788_s19 = smov 0   ;;  %s1790_s20 = smov 0  }
   0x6   :  { %s1792_s21 = smov 0   ;;  %s1794_s22 = smov 0  }
   0x7   :  { %s1796_s23 = smov 0   ;;  %s1798_s24 = smov 0  }
   0x8 LB: > { %2399 = sst [smem:[#allocation6_spill]] %s1728_s19  ;;  %s1339_s25 = sadd.s32 4294967295, %s1748_s24   ;;  %s1748_s24 = sphi %s1798_s24, %s17_s24   ;;  %s1744_s23 = sphi %s1796_s23, %s2433_s23   ;;  %s1740_s22 = sphi %s1794_s22, %s2432_s22   ;;  %s1736_s21 = sphi %s1792_s21, %s2431_s21   ;;  %s1732_s20 = sphi %s1790_s20, %s2430_s20   ;;  %s1728_s19 = sphi %s1788_s19, %s2429_s19   ;;  %s1724_s18 = sphi %s1786_s18, %s2428_s18   ;;  %s1720_s17 = sphi %s1784_s17, %s2436_s17   ;;  %s1716_s16 = sphi %s1782_s16, %s2435_s16   ;;  %s1712_s15 = sphi %s1780_s15, %s2434_s15  }
   0x9   : > { %2400 = sst [smem:[#allocation7_spill]] %s1740_s22  ;;  %s1340_s26 = sadd.s32 4294967294, %s1748_s24  }
   0xa   : > { %2401 = sst [smem:[#allocation8_spill]] %s1744_s23  ;;  %s26_s27 = sadd.s32 1, %s1740_s22 }
   0xb   : > { %s29_s28 = sadd.s32 1, %s1744_s23  ;;  %p27_p0 = scmp.ge.s32.totalorder %s26_s27, 2 }
   0xc   : > { %s90_s29 = sadd.s32 1, %s1728_s19  ;;  %p97_p1 = scmp.ne.s32.totalorder %s1728_s19, %s1724_s18 }
   0xd   : > { %p98_p2 = scmp.eq.s32.totalorder %s1748_s24, 0  ;;  %s2438_s27 = smov (%p27_p0, %s26_s27), 0 }
   0xe   : > { %2402 = sst [smem:[#allocation9_spill]] %s2438_s27  ;;  %s2440_s28 = smov (!%p27_p0, %s29_s28), %s1744_s23 }
   0xf   : > { %s86_s30 = ssub.s32 %s1740_s22, %s2438_s27  ;;  %p1843_p3 = por %p98_p2, %p97_p1 }
  0x10   : > { %p31_p4 = scmp.ge.s32.totalorder %s2440_s28, 2  ;;  %s142_s6 = sadd.s32 1, %s1720_s17 }
  0x11   : > { %p152_p5 = scmp.ne.s32.totalorder %s1720_s17, %s1716_s16  ;;  %p153_p6 = scmp.eq.s32.totalorder %s1339_s25, 3 }
  0x12   : > { %s2442_s28 = smov (%p31_p4, %s2440_s28), 0  ;;  %p158_p8 = scmp.ne.s32.totalorder %s1716_s16, %s1712_s15 }
  0x13   : > { %2404 = sst [smem:[#allocation10_spill]] %s2442_s28  ;;  %p1852_p7 = por %p153_p6, %p152_p5 }
  0x14   : > { %s85_s8 = ssub.s32 %s1744_s23, %s2442_s28  ;;  %p159_p9 = scmp.eq.s32.totalorder %s1340_s26, 3 }
  0x15   : > { %s87_s9 = sor.u32 %s86_s30, %s85_s8  ;;  %p140_p10 = scmp.eq.s32.totalorder %s85_s8, 0 }
  0x16   : > { %p88_p11 = scmp.eq.s32.totalorder %s87_s9, 0  ;;  %p1860_p12 = por %p159_p9, %p158_p8 }
  0x17   : > { %s1865_s11 = scalar_select %p140_p10, %s1720_s17, %s142_s6  }
  0x18   : > { %s1868_s12 = scalar_select %p88_p11, %s1728_s19, %s90_s29  }
  0x19   : > { %p1342_p13 = scmp.ge.s32.totalorder %s1748_s24, 4 }
  0x1a   : > { %2407 = sst [smem:[#allocation11_spill]] %s1868_s12 }
  0x1b   : > { %175 = sbr.rel (%p1342_p13) target bundleno = 46 (0x2e), region = 16 }
  0x20   : > { %193 = sbr.rel (!%p1843_p3) target bundleno = 46 (0x2e), region = 28  ;;  %s195_s13 = sand.u32 (%p1843_p3), 1, %s1728_s19  }
  0x21   : > { %s1409_s14 = sshll.u32 (%p1843_p3), %s1744_s23, 3  ;;  %s1343_s25 = sshll.u32 (%p1843_p3), %s195_s13, 5 }
  0x22   : > { %s200_s26 = sadd.s32 (%p1843_p3), %s1740_s22, %s1409_s14  ;;  %s2408_s2 = sld [smem:[#allocation12_spill]] (%p1843_p3) }
  0x23   : > { %s1346_s30 = sshll.u32 (%p1843_p3), %s200_s26, 3  ;;  %s197_s29 = scalar_lea.vmem (%p1843_p3), [#allocation2], %s1343_s25 }
  0x28   : > { %s202_s6 = scalar_lea.vmem %s2408_s2, %s1346_s30 }
  0x29   : > { %v237_v0 = vld [vmem:[%s202_s6] sm:$0xff]  ;;  %v239_v1 = vld [vmem:[%s202_s6 + $0x10] sm:$0xff] }
  0x2a   : > { %v241_v2 = vld [vmem:[%s202_s6 + $0x20] sm:$0xff]  ;;  %238 = vst [vmem:[%s197_s29] sm:$0xff] %v237_v0  ;;  %v243_v3 = vld [vmem:[%s202_s6 + $0x30] sm:$0xff] }
  0x2b   : > { %240 = vst [vmem:[%s197_s29 + $0x8] sm:$0xff] %v239_v1 }
  0x2c   : > { %242 = vst [vmem:[%s197_s29 + $0x10] sm:$0xff] %v241_v2 }
  0x2d   : > { %244 = vst [vmem:[%s197_s29 + $0x18] sm:$0xff] %v243_v3 }
  0x2e PF: > { %p1347_p0 = scmp.ge.s32.totalorder %s1748_s24, 1  ;;  %p258_p1 = scmp.lt.s32.totalorder %s1748_s24, 5 }
  0x30   : > { %p259_p2 = pnand %p1347_p0, %p258_p1 }
  0x31   : > { %s265_s5 = sand.u32 (!%p259_p2), 1, %s1724_s18   ;;  %s2393_s13 = sand.u32 (!%p259_p2), 1, %s1716_s16  }
  0x32   : > { %262 = sbr.rel (%p259_p2) target bundleno = 609 (0x261), region = 70  ;;  %s1348_s14 = sshll.u32 (!%p259_p2), %s265_s5, 5 }
  0x33   : > { %s1349_s25 = sshll.u32 (!%p259_p2), %s2393_s13, 7  ;;  %s1350_s26 = sshll.u32 (!%p259_p2), %s1736_s21, 4 }
  0x34   : > { %p309_p3 = scmp.lt.s32.totalorder (!%p259_p2), %s1732_s20, 1  ;;  %p304_p4 = scmp.lt.s32.totalorder (!%p259_p2), %s1350_s26, 31 }
  0x35   : > { %s1352_s30 = sshll.u32 (!%p259_p2), %s1732_s20, 4  ;;  %s1905_s12 = scalar_lea.vmem (!%p259_p2), [#allocation2], %s1348_s14 }
  0x36   : > { %p314_p5 = scmp.lt.s32.totalorder (!%p259_p2), %s1352_s30, 31  ;;  %s1907_s19 = scalar_lea.vmem (!%p259_p2), [#allocation3], %s1349_s25 }
  0x37   : > { %s1889_s8 = scalar_select %p309_p3, %s1732_s20, 1 }
  0x38   : > { %s2444_s26 = smov (!%p304_p4, %s1350_s26), 31  ;;  %s2446_s30 = smov (!%p314_p5, %s1352_s30), 31 }
  0x39   : > { %s311_s29 = scalar_lea.vmem %s2388_s1, %s1889_s8  ;;  %s1351_s2 = sshll.u32 %s2444_s26, 3 }
  0x3a   : > { %s1898_s5 = scalar_lea.vmem %s2387_s0, %s1351_s2  ;;  %s1353_s13 = sshll.u32 %s2446_s30, 2 }
  0x3b   : > { %s1903_s22 = scalar_lea.vmem %s2390_s3, %s1353_s13  ;;  %p1354_p6 = scmp.ne.s32.totalorder %s1732_s20, 0 }
  0x3d   : > { %323 = sbr.rel (%p1354_p6) target bundleno = 83 (0x53), region = 78 }
  0x42   : > { %v1750_v4 = vmov 0.0  }
  0x43   : > { %324 = vst [vmem:[%s1907_s19] sm:$0xff] %v1750_v4 }
  0x44   : > { %325 = vst [vmem:[%s1907_s19 + $0x8] sm:$0xff] %v1750_v4 }
  0x45   : > { %326 = vst [vmem:[%s1907_s19 + $0x10] sm:$0xff] %v1750_v4 }
  0x46   : > { %327 = vst [vmem:[%s1907_s19 + $0x18] sm:$0xff] %v1750_v4 }
  0x47   : > { %328 = vst [vmem:[%s1907_s19 + $0x20] sm:$0xff] %v1750_v4 }
  0x48   : > { %329 = vst [vmem:[%s1907_s19 + $0x28] sm:$0xff] %v1750_v4 }
  0x49   : > { %330 = vst [vmem:[%s1907_s19 + $0x30] sm:$0xff] %v1750_v4 }
  0x4a   : > { %331 = vst [vmem:[%s1907_s19 + $0x38] sm:$0xff] %v1750_v4 }
  0x4b   : > { %332 = vst [vmem:[%s1907_s19 + $0x40] sm:$0xff] %v1750_v4 }
  0x4c   : > { %333 = vst [vmem:[%s1907_s19 + $0x48] sm:$0xff] %v1750_v4 }
  0x4d   : > { %334 = vst [vmem:[%s1907_s19 + $0x50] sm:$0xff] %v1750_v4 }
  0x4e   : > { %335 = vst [vmem:[%s1907_s19 + $0x58] sm:$0xff] %v1750_v4 }
  0x4f   : > { %336 = vst [vmem:[%s1907_s19 + $0x60] sm:$0xff] %v1750_v4 }
  0x50   : > { %337 = vst [vmem:[%s1907_s19 + $0x68] sm:$0xff] %v1750_v4 }
  0x51   : > { %338 = vst [vmem:[%s1907_s19 + $0x70] sm:$0xff] %v1750_v4 }
  0x52   : > { %339 = vst [vmem:[%s1907_s19 + $0x78] sm:$0xff] %v1750_v4 }
  0x53 PF: > { %v352_v5 = vld [vmem:[%s1898_s5 + $0x60] sm:$0xff]  ;;  %v1751_v8 = vmov 0   ;;  %v353_v9 = vld [vmem:[%s1898_s5 + $0x68] sm:$0xff]  ;;  %v350_v14 = vld [vmem:[%s1898_s5 + $0x50] sm:$0xff]  ;;  %p1387_p8 = scmp.ne.s32.totalorder %s1732_s20, 1 }
  0x54   : > { %v348_v6 = vld [vmem:[%s1898_s5 + $0x40] sm:$0xff]  ;;  %1537 = vset.pattern.permute.xlu2 %v1751_v8  ;;  %1536 = vset.pattern.permute.xlu1 %v1751_v8  ;;  %v349_v10 = vld [vmem:[%s1898_s5 + $0x48] sm:$0xff]  ;;  %v354_v15 = vld [vmem:[%s1898_s5 + $0x70] sm:$0xff] }
  0x55   : > { %v340_v7 = vld [vmem:[%s1898_s5] sm:$0xff]  ;;  %1535 = vset.pattern.permute.xlu0 %v1751_v8  ;;  %419 = vperm.xlu1 %1536, %v352_v5   ;;  %v341_v11 = vld [vmem:[%s1898_s5 + $0x8] sm:$0xff]  ;;  %v351_v16 = vld [vmem:[%s1898_s5 + $0x58] sm:$0xff] }
  0x56   : > { %399 = vperm.xlu0 %1535, %v348_v6   ;;  %359 = vperm.xlu2 %1537, %v340_v7   ;;  %v345_v12 = vld [vmem:[%s1898_s5 + $0x28] sm:$0xff]  ;;  %v344_v13 = vld [vmem:[%s1898_s5 + $0x20] sm:$0xff]  ;;  %v355_v17 = vld [vmem:[%s1898_s5 + $0x78] sm:$0xff] }
  0x57   : > { %v343_v18 = vld [vmem:[%s1898_s5 + $0x18] sm:$0xff]  ;;  %v342_v19 = vld [vmem:[%s1898_s5 + $0x10] sm:$0xff]  ;;  %v1415_v24 = vld [vmem:[%s1903_s22 + $0x28] sm:$0xff] }
  0x58   : > { %v346_v20 = vld [vmem:[%s1898_s5 + $0x30] sm:$0xff]  ;;  %v347_v21 = vld [vmem:[%s1898_s5 + $0x38] sm:$0xff]  ;;  %v1414_v25 = vld [vmem:[%s1903_s22 + $0x20] sm:$0xff] }
  0x59   : > { %v1417_v22 = vld [vmem:[%s1903_s22 + $0x38] sm:$0xff]  ;;  %v1416_v23 = vld [vmem:[%s1903_s22 + $0x30] sm:$0xff]  ;;  %v1952_v27 = vld [vmem:[%s311_s29] ss:$0 sm:$0xff] }
  0x5a   : > { %692 = vmatpush.bf16.msra.mxu0 %v1417_v22  ;;  %1420 = vmatpush.bf16.msra.mxu2 %v1417_v22  ;;  %v1413_v26 = vld [vmem:[%s1903_s22 + $0x18] sm:$0xff]  ;;  %v1412_v28 = vld [vmem:[%s1903_s22 + $0x10] sm:$0xff]  ;;  %v1411_v31 = vld [vmem:[%s1903_s22 + $0x8] sm:$0xff] }
  0x5b   : > { %1421 = vmatpush.bf16.msra.mxu3 %v1417_v22  ;;  %1419 = vmatpush.bf16.msra.mxu1 %v1417_v22  ;;  %v1410_v35 = vld [vmem:[%s1903_s22] sm:$0xff]  ;;  %v1967_v63 = vld [vmem:[%s1905_s12 + $0x10] sm:$0xff]  ;;  %v1970_v0 = vld [vmem:[%s1905_s12 + $0x18] sm:$0xff] }
  0x5c   : > { %v1960_v39 = vld [vmem:[%s1905_s12] sm:$0xff]  ;;  %v564_v7 = vunpack.c.0.s8 %v1967_v63  ;;  %v565_v8 = vunpack.c.1.s8 %v1967_v63 }
  0x5d   : > { %424 = vperm.xlu1 %1536, %v353_v9   ;;  %v556_v43 = vunpack.c.0.s8 %v1960_v39  ;;  %v557_v45 = vunpack.c.1.s8 %v1960_v39  ;;  %v568_v9 = vunpack.c.0.s8 %v1970_v0 }
  0x5e   : > { %404 = vperm.xlu0 %1535, %v349_v10   ;;  %364 = vperm.xlu2 %1537, %v341_v11  }
  0x5f   : > { %693 = vmatpush.bf16.msra.mxu0 %v1416_v23  ;;  %1423 = vmatpush.bf16.msra.mxu2 %v1416_v23  ;;  %v572_v46 = vcvt.s32.f32 %v556_v43  ;;  %v573_v48 = vcvt.s32.f32 %v557_v45 }
  0x60   : > { %1424 = vmatpush.bf16.msra.mxu3 %v1416_v23  ;;  %1422 = vmatpush.bf16.msra.mxu1 %v1416_v23 }
  0x63   : > { %694 = vmatpush.bf16.msra.mxu0 %v1415_v24  ;;  %1426 = vmatpush.bf16.msra.mxu2 %v1415_v24 }
  0x64   : > { %1427 = vmatpush.bf16.msra.mxu3 %v1415_v24  ;;  %1425 = vmatpush.bf16.msra.mxu1 %v1415_v24  ;;  %v580_v24 = vcvt.s32.f32 %v564_v7 }
  0x65   : > { %384 = vperm.xlu1 %1536, %v345_v12  }
  0x66   : > { %379 = vperm.xlu0 %1535, %v344_v13   ;;  %409 = vperm.xlu2 %1537, %v350_v14  }
  0x67   : > { %695 = vmatpush.bf16.msra.mxu0 %v1414_v25  ;;  %1429 = vmatpush.bf16.msra.mxu2 %v1414_v25 }
  0x68   : > { %1430 = vmatpush.bf16.msra.mxu3 %v1414_v25  ;;  %1428 = vmatpush.bf16.msra.mxu1 %v1414_v25  ;;  %v581_v25 = vcvt.s32.f32 %v565_v8 }
  0x6b   : > { %696 = vmatpush.bf16.msra.mxu0 %v1413_v26  ;;  %1432 = vmatpush.bf16.msra.mxu2 %v1413_v26 }
  0x6c   : > { %1433 = vmatpush.bf16.msra.mxu3 %v1413_v26  ;;  %1431 = vmatpush.bf16.msra.mxu1 %v1413_v26  ;;  %v584_v26 = vcvt.s32.f32 %v568_v9 }
  0x6d   : > { %429 = vperm.xlu1 %1536, %v354_v15  }
  0x6e   : > { %414 = vperm.xlu0 %1535, %v351_v16   ;;  %434 = vperm.xlu2 %1537, %v355_v17  }
  0x6f   : > { %697 = vmatpush.bf16.msra.mxu0 %v1412_v28  ;;  %1435 = vmatpush.bf16.msra.mxu2 %v1412_v28 }
  0x70   : > { %1436 = vmatpush.bf16.msra.mxu3 %v1412_v28  ;;  %1434 = vmatpush.bf16.msra.mxu1 %v1412_v28 }
  0x73   : > { %698 = vmatpush.bf16.msra.mxu0 %v1411_v31  ;;  %1438 = vmatpush.bf16.msra.mxu2 %v1411_v31 }
  0x74   : > { %1439 = vmatpush.bf16.msra.mxu3 %v1411_v31  ;;  %1437 = vmatpush.bf16.msra.mxu1 %v1411_v31 }
  0x75   : > { %374 = vperm.xlu1 %1536, %v343_v18   ;;  %v569_v18 = vunpack.c.1.s8 %v1970_v0 }
  0x76   : > { %369 = vperm.xlu0 %1535, %v342_v19   ;;  %389 = vperm.xlu2 %1537, %v346_v20  }
  0x77   : > { %699 = vmatpush.bf16.msra.mxu0 %v1410_v35  ;;  %1441 = vmatpush.bf16.msra.mxu2 %v1410_v35 }
  0x78   : > { %1442 = vmatpush.bf16.msra.mxu3 %v1410_v35  ;;  %1440 = vmatpush.bf16.msra.mxu1 %v1410_v35 }
  0x7e   : > { %394 = vperm.xlu0 %1535, %v347_v21  }
  0xb0   : > { %v360_v29 = vpop.permute.xlu2 %359 }
  0xb1   : > { %v440_v30 = vadd.f32 %v1952_v27, %v360_v29 }
  0xb3   : > { %vm456_vm0 = vcmp.gt.f32.partialorder %v440_v30, 0.0  ;;  %v472_v32 = vsub.f32 0.0, %v440_v30  ;;  %v488_v33 = vmul.f32 -0.2, %v440_v30  ;;  %v585_v30 = vcvt.s32.f32 %v569_v18 }
  0xb4   : > { %v570_v18 = vunpack.c.2.s8 %v1970_v0 }
  0xb5   : > { %v504_v34 = vsel %vm456_vm0, %v472_v32, %v488_v33 }
  0xb6   : > { %v520_v36 = vmul.f32 1.442695, %v504_v34 }
  0xb8   : > { %v365_v37 = vpop.permute.xlu2 %364  ;;  %1539 = vpow2.f32 %v520_v36 }
  0xb9   : > { %v441_v38 = vadd.f32 %v1952_v27, %v365_v37 }
  0xbb   : > { %vm457_vm1 = vcmp.gt.f32.partialorder %v441_v38, 0.0  ;;  %v473_v40 = vsub.f32 0.0, %v441_v38  ;;  %v489_v41 = vmul.f32 -0.2, %v441_v38 }
  0xbd   : > { %v505_v42 = vsel %vm457_vm1, %v473_v40, %v489_v41 }
  0xbe   : > { %v522_v44 = vmul.f32 1.442695, %v505_v42  ;;  %v1540_v47 = vpop.eup %1539 }
  0xbf   : > { %v588_v49 = vmul.f32 %v1540_v47, %v572_v46 }
  0xc0   : > { %1541 = vpow2.f32 %v522_v44  ;;  %v410_v57 = vpop.permute.xlu2 %409 }
  0xc1   : > { %v450_v15 = vadd.f32 %v1952_v27, %v410_v57 }
  0xc3   : > { %vm466_vm6 = vcmp.gt.f32.partialorder %v450_v15, 0.0  ;;  %v482_v32 = vsub.f32 0.0, %v450_v15  ;;  %v498_v33 = vmul.f32 -0.2, %v450_v15 }
  0xc5   : > { %v514_v46 = vsel %vm466_vm6, %v482_v32, %v498_v33  ;;  %v586_v32 = vcvt.s32.f32 %v570_v18  ;;  %v613_v18 = vld [vmem:[%s1907_s19 + $0x8] sm:$0xff] }
  0xc6   : > { %v1542_v50 = vpop.eup %1541 }
  0xc7   : > { %v420_v51 = vpop.permute.xlu1 %419  ;;  %v589_v52 = vmul.f32 %v1542_v50, %v573_v48 }
  0xc8   : > { %v452_v53 = vadd.f32 %v1952_v27, %v420_v51  ;;  %v400_v54 = vpop.permute.xlu0 %399  ;;  %v435_v16 = vpop.permute.xlu2 %434 }
  0xc9   : > { %v448_v55 = vadd.f32 %v1952_v27, %v400_v54  ;;  %v604_v56 = vpack.c.bf16 %v589_v52, %v588_v49  ;;  %v455_v19 = vadd.f32 %v1952_v27, %v435_v16  ;;  %v1984_v49 = vld [vmem:[%s1905_s12 + $0x8] sm:$0xff] }
  0xca   : > { %vm468_vm2 = vcmp.gt.f32.partialorder %v452_v53, 0.0  ;;  %v484_v58 = vsub.f32 0.0, %v452_v53  ;;  %v500_v59 = vmul.f32 -0.2, %v452_v53  ;;  %v561_v54 = vunpack.c.1.s8 %v1984_v49 }
  0xcb   : > { %v480_v60 = vsub.f32 0.0, %v448_v55  ;;  %v496_v61 = vmul.f32 -0.2, %v448_v55  ;;  %700 = vmatmul.bf16.vlgmr.msra.gmra.mxu0 %v604_v56  ;;  %vm464_vm3 = vcmp.gt.f32.partialorder %v448_v55, 0.0  ;;  %v487_v34 = vsub.f32 0.0, %v455_v19 }
  0xcc   : > { %v516_v62 = vsel %vm468_vm2, %v484_v58, %v500_v59  ;;  %v503_v36 = vmul.f32 -0.2, %v455_v19  ;;  %vm471_vm8 = vcmp.gt.f32.partialorder %v455_v19, 0.0  ;;  %v560_v58 = vunpack.c.0.s8 %v1984_v49 }
  0xcd   : > { %v544_v1 = vmul.f32 1.442695, %v516_v62  ;;  %v512_v2 = vsel %vm464_vm3, %v480_v60, %v496_v61  ;;  %v540_v59 = vmul.f32 1.442695, %v514_v46  ;;  %v577_v7 = vcvt.s32.f32 %v561_v54 }
  0xce   : > { %v536_v10 = vmul.f32 1.442695, %v512_v2  ;;  %v519_v51 = vsel %vm471_vm8, %v487_v34, %v503_v36  ;;  %v558_v54 = vunpack.c.2.s8 %v1960_v39 }
  0xcf   : > { %v425_v3 = vpop.permute.xlu1 %424  ;;  %1543 = vpow2.f32 %v544_v1  ;;  %v550_v1 = vmul.f32 1.442695, %v519_v51  ;;  %v559_v51 = vunpack.c.3.s8 %v1960_v39 }
  0xd0   : > { %v453_v4 = vadd.f32 %v1952_v27, %v425_v3  ;;  %v405_v5 = vpop.permute.xlu0 %404  ;;  %1545 = vpow2.f32 %v536_v10  ;;  %v390_v8 = vpop.permute.xlu2 %389 }
  0xd1   : > { %v449_v6 = vadd.f32 %v1952_v27, %v405_v5 }
  0xd2   : > { %vm469_vm4 = vcmp.gt.f32.partialorder %v453_v4, 0.0  ;;  %v485_v11 = vsub.f32 0.0, %v453_v4  ;;  %v501_v12 = vmul.f32 -0.2, %v453_v4  ;;  %v566_v4 = vunpack.c.2.s8 %v1967_v63 }
  0xd3   : > { %vm465_vm5 = vcmp.gt.f32.partialorder %v449_v6, 0.0  ;;  %v481_v13 = vsub.f32 0.0, %v449_v6  ;;  %v497_v14 = vmul.f32 -0.2, %v449_v6 }
  0xd4   : > { %v517_v17 = vsel %vm469_vm4, %v485_v11, %v501_v12  ;;  %v576_v11 = vcvt.s32.f32 %v560_v58 }
  0xd5   : > { %v546_v20 = vmul.f32 1.442695, %v517_v17  ;;  %v513_v21 = vsel %vm465_vm5, %v481_v13, %v497_v14  ;;  %v1544_v31 = vpop.eup %1543  ;;  %v567_v13 = vunpack.c.3.s8 %v1967_v63  ;;  %v571_v14 = vunpack.c.3.s8 %v1970_v0 }
  0xd6   : > { %v538_v22 = vmul.f32 1.442695, %v513_v21  ;;  %v1546_v42 = vpop.eup %1545  ;;  %v600_v44 = vmul.f32 %v1544_v31, %v584_v26  ;;  %v582_v26 = vcvt.s32.f32 %v566_v4 }
  0xd7   : > { %1547 = vpow2.f32 %v546_v20  ;;  %v385_v23 = vpop.permute.xlu1 %384  ;;  %v596_v56 = vmul.f32 %v1546_v42, %v580_v24  ;;  %v446_v20 = vadd.f32 %v1952_v27, %v390_v8  ;;  %v583_v31 = vcvt.s32.f32 %v567_v13 }
  0xd8   : > { %1549 = vpow2.f32 %v538_v22  ;;  %v445_v28 = vadd.f32 %v1952_v27, %v385_v23  ;;  %v380_v29 = vpop.permute.xlu0 %379 }
  0xd9   : > { %v444_v35 = vadd.f32 %v1952_v27, %v380_v29  ;;  %v478_v33 = vsub.f32 0.0, %v446_v20  ;;  %vm462_vm14 = vcmp.gt.f32.partialorder %v446_v20, 0.0 }
  0xda   : > { %vm461_vm7 = vcmp.gt.f32.partialorder %v445_v28, 0.0  ;;  %v477_v37 = vsub.f32 0.0, %v445_v28  ;;  %v493_v38 = vmul.f32 -0.2, %v445_v28  ;;  %v587_v28 = vcvt.s32.f32 %v571_v14 }
  0xdb   : > { %vm460_vm9 = vcmp.gt.f32.partialorder %v444_v35, 0.0  ;;  %v476_v40 = vsub.f32 0.0, %v444_v35  ;;  %v492_v41 = vmul.f32 -0.2, %v444_v35 }
  0xdc   : > { %v509_v43 = vsel %vm461_vm7, %v477_v37, %v493_v38  ;;  %v494_v37 = vmul.f32 -0.2, %v446_v20 }
  0xdd   : > { %v1548_v45 = vpop.eup %1547  ;;  %v530_v47 = vmul.f32 1.442695, %v509_v43  ;;  %v508_v48 = vsel %vm460_vm9, %v476_v40, %v492_v41 }
  0xde   : > { %v1550_v50 = vpop.eup %1549  ;;  %v528_v52 = vmul.f32 1.442695, %v508_v48  ;;  %v601_v53 = vmul.f32 %v1548_v45, %v585_v30 }
  0xdf   : > { %1551 = vpow2.f32 %v530_v47  ;;  %v430_v55 = vpop.permute.xlu1 %429  ;;  %v597_v57 = vmul.f32 %v1550_v50, %v581_v25 }
  0xe0   : > { %1553 = vpow2.f32 %v528_v52  ;;  %v454_v60 = vadd.f32 %v1952_v27, %v430_v55  ;;  %v415_v61 = vpop.permute.xlu0 %414  ;;  %v610_v62 = vpack.c.bf16 %v601_v53, %v600_v44  ;;  %v510_v52 = vsel %vm462_vm14, %v478_v33, %v494_v37 }
  0xe1   : > { %v451_v2 = vadd.f32 %v1952_v27, %v415_v61  ;;  %v608_v3 = vpack.c.bf16 %v597_v57, %v596_v56  ;;  %1555 = vpow2.f32 %v540_v59  ;;  %v532_v59 = vmul.f32 1.442695, %v510_v52 }
  0xe2   : > { %vm470_vm10 = vcmp.gt.f32.partialorder %v454_v60, 0.0  ;;  %v486_v5 = vsub.f32 0.0, %v454_v60  ;;  %v502_v6 = vmul.f32 -0.2, %v454_v60  ;;  %730 = vmatmul.bf16.vlgmr.msra.gmra.mxu3 %v610_v62  ;;  %1557 = vpow2.f32 %v550_v1 }
  0xe3   : > { %vm467_vm11 = vcmp.gt.f32.partialorder %v451_v2, 0.0  ;;  %v483_v9 = vsub.f32 0.0, %v451_v2  ;;  %v499_v10 = vmul.f32 -0.2, %v451_v2  ;;  %720 = vmatmul.bf16.vlgmr.msra.gmra.mxu2 %v608_v3  ;;  %v575_v60 = vcvt.s32.f32 %v559_v51 }
  0xe4   : > { %v518_v12 = vsel %vm470_vm10, %v486_v5, %v502_v6  ;;  %v574_v1 = vcvt.s32.f32 %v558_v54  ;;  %v615_v54 = vld [vmem:[%s1907_s19 + $0x18] sm:$0xff] }
  0xe5   : > { %v1552_v15 = vpop.eup %1551  ;;  %v548_v16 = vmul.f32 1.442695, %v518_v12  ;;  %v515_v17 = vsel %vm467_vm11, %v483_v9, %v499_v10 }
  0xe6   : > { %v1554_v19 = vpop.eup %1553  ;;  %v542_v21 = vmul.f32 1.442695, %v515_v17  ;;  %v593_v22 = vmul.f32 %v1552_v15, %v577_v7  ;;  %v562_v7 = vunpack.c.2.s8 %v1984_v49 }
  0xe7   : > { %1559 = vpow2.f32 %v548_v16  ;;  %v375_v23 = vpop.permute.xlu1 %374  ;;  %v592_v24 = vmul.f32 %v1554_v19, %v576_v11  ;;  %v1556_v0 = vpop.eup %1555  ;;  %v612_v16 = vld [vmem:[%s1907_s19] sm:$0xff] }
  0xe8   : > { %1561 = vpow2.f32 %v542_v21  ;;  %v443_v25 = vadd.f32 %v1952_v27, %v375_v23  ;;  %v370_v63 = vpop.permute.xlu0 %369  ;;  %v1558_v36 = vpop.eup %1557  ;;  %v598_v45 = vmul.f32 %v1556_v0, %v582_v26  ;;  %v578_v9 = vcvt.s32.f32 %v562_v7  ;;  %v624_v21 = vld [vmem:[%s1907_s19 + $0x60] sm:$0xff] }
  0xe9   : > { %v442_v29 = vadd.f32 %v1952_v27, %v370_v63  ;;  %v606_v30 = vpack.c.bf16 %v593_v22, %v592_v24  ;;  %v603_v50 = vmul.f32 %v1558_v36, %v587_v28  ;;  %v620_v22 = vld [vmem:[%s1907_s19 + $0x40] sm:$0xff] }
  0xea   : > { %vm459_vm12 = vcmp.gt.f32.partialorder %v443_v25, 0.0  ;;  %v475_v34 = vsub.f32 0.0, %v443_v25  ;;  %v491_v35 = vmul.f32 -0.2, %v443_v25  ;;  %v616_v63 = vld [vmem:[%s1907_s19 + $0x20] sm:$0xff] }
  0xeb   : > { %vm458_vm13 = vcmp.gt.f32.partialorder %v442_v29, 0.0  ;;  %v474_v38 = vsub.f32 0.0, %v442_v29  ;;  %v490_v40 = vmul.f32 -0.2, %v442_v29  ;;  %710 = vmatmul.bf16.vlgmr.msra.gmra.mxu1 %v606_v30  ;;  %v625_v30 = vld [vmem:[%s1907_s19 + $0x68] sm:$0xff] }
  0xec   : > { %v507_v41 = vsel %vm459_vm12, %v475_v34, %v491_v35  ;;  %v617_v34 = vld [vmem:[%s1907_s19 + $0x28] sm:$0xff] }
  0xed   : > { %v1560_v42 = vpop.eup %1559  ;;  %v526_v43 = vmul.f32 1.442695, %v507_v41  ;;  %v506_v44 = vsel %vm458_vm13, %v474_v38, %v490_v40  ;;  %v626_v38 = vld [vmem:[%s1907_s19 + $0x70] sm:$0xff] }
  0xee   : > { %v1562_v46 = vpop.eup %1561  ;;  %v524_v47 = vmul.f32 1.442695, %v506_v44  ;;  %v602_v48 = vmul.f32 %v1560_v42, %v586_v32  ;;  %v622_v40 = vld [vmem:[%s1907_s19 + $0x50] sm:$0xff] }
  0xef   : > { %1563 = vpow2.f32 %v526_v43  ;;  %v599_v53 = vmul.f32 %v1562_v46, %v583_v31  ;;  %v621_v31 = vld [vmem:[%s1907_s19 + $0x48] sm:$0xff]  ;;  %v614_v44 = vld [vmem:[%s1907_s19 + $0x10] sm:$0xff] }
  0xf0   : > { %1565 = vpow2.f32 %v524_v47  ;;  %v395_v55 = vpop.permute.xlu0 %394  ;;  %v611_v56 = vpack.c.bf16 %v603_v50, %v602_v48  ;;  %v627_v48 = vld [vmem:[%s1907_s19 + $0x78] sm:$0xff] }
  0xf1   : > { %v447_v57 = vadd.f32 %v1952_v27, %v395_v55  ;;  %v609_v58 = vpack.c.bf16 %v599_v53, %v598_v45  ;;  %1567 = vpow2.f32 %v532_v59  ;;  %v563_v27 = vunpack.c.3.s8 %v1984_v49  ;;  %v623_v50 = vld [vmem:[%s1907_s19 + $0x58] sm:$0xff]  ;;  %v618_v55 = vld [vmem:[%s1907_s19 + $0x30] sm:$0xff] }
  0xf2   : > { %735 = vmatmul.bf16.gmra.mxu3 %v611_v56 }
  0xf3   : > { %vm463_vm15 = vcmp.gt.f32.partialorder %v447_v57, 0.0  ;;  %v479_v61 = vsub.f32 0.0, %v447_v57  ;;  %v495_v62 = vmul.f32 -0.2, %v447_v57  ;;  %725 = vmatmul.bf16.gmra.mxu2 %v609_v58  ;;  %v579_v10 = vcvt.s32.f32 %v563_v27 }
  0xf5   : > { %v1564_v2 = vpop.eup %1563  ;;  %v511_v3 = vsel %vm463_vm15, %v479_v61, %v495_v62  ;;  %v619_v61 = vld [vmem:[%s1907_s19 + $0x38] sm:$0xff] }
  0xf6   : > { %v1566_v4 = vpop.eup %1565  ;;  %v534_v5 = vmul.f32 1.442695, %v511_v3  ;;  %v591_v39 = vmul.f32 %v1564_v2, %v575_v60 }
  0xf7   : > { %v590_v6 = vmul.f32 %v1566_v4, %v574_v1  ;;  %v1568_v11 = vpop.eup %1567 }
  0xf8   : > { %1569 = vpow2.f32 %v534_v5  ;;  %v594_v13 = vmul.f32 %v1568_v11, %v578_v9 }
  0xf9   : > { %v605_v8 = vpack.c.bf16 %v591_v39, %v590_v6 }
  0xfb   : > { %705 = vmatmul.bf16.gmra.mxu0 %v605_v8 }
  0xfe   : > { %v1570_v12 = vpop.eup %1569 }
  0xff   : > { %v595_v14 = vmul.f32 %v1570_v12, %v579_v10 }
 0x101   : > { %v607_v15 = vpack.c.bf16 %v595_v14, %v594_v13 }
 0x103   : > { %715 = vmatmul.bf16.gmra.mxu1 %v607_v15 }
 0x148   : > { %v701_v17 = vpop.f32.mrf.mxu0 }
 0x149   : > { %v741_v49 = vadd.f32 %v701_v17, %v612_v16 }
 0x14b   : > { %757 = vst [vmem:[%s1907_s19] sm:$0xff] %v741_v49 }
 0x150   : > { %v703_v19 = vpop.f32.mrf.mxu0 }
 0x151   : > { %v742_v20 = vadd.f32 %v703_v19, %v613_v18 }
 0x153   : > { %758 = vst [vmem:[%s1907_s19 + $0x8] sm:$0xff] %v742_v20 }
 0x165   : > { %v731_v23 = vpop.f32.mrf.mxu3 }
 0x166   : > { %v721_v24 = vpop.f32.mrf.mxu2  ;;  %v753_v25 = vadd.f32 %v731_v23, %v624_v21 }
 0x167   : > { %v749_v26 = vadd.f32 %v721_v24, %v620_v22 }
 0x168   : > { %769 = vst [vmem:[%s1907_s19 + $0x60] sm:$0xff] %v753_v25  ;;  %v711_v28 = vpop.f32.mrf.mxu1 }
 0x169   : > { %765 = vst [vmem:[%s1907_s19 + $0x40] sm:$0xff] %v749_v26  ;;  %v745_v29 = vadd.f32 %v711_v28, %v616_v63 }
 0x16b   : > { %761 = vst [vmem:[%s1907_s19 + $0x20] sm:$0xff] %v745_v29 }
 0x16d   : > { %v733_v32 = vpop.f32.mrf.mxu3 }
 0x16e   : > { %v723_v0 = vpop.f32.mrf.mxu2  ;;  %v754_v33 = vadd.f32 %v733_v32, %v625_v30 }
 0x16f   : > { %v750_v35 = vadd.f32 %v723_v0, %v621_v31 }
 0x170   : > { %770 = vst [vmem:[%s1907_s19 + $0x68] sm:$0xff] %v754_v33  ;;  %v713_v36 = vpop.f32.mrf.mxu1 }
 0x171   : > { %766 = vst [vmem:[%s1907_s19 + $0x48] sm:$0xff] %v750_v35  ;;  %v746_v37 = vadd.f32 %v713_v36, %v617_v34 }
 0x173   : > { %762 = vst [vmem:[%s1907_s19 + $0x28] sm:$0xff] %v746_v37 }
 0x175   : > { %v736_v41 = vpop.f32.mrf.mxu3 }
 0x176   : > { %v726_v42 = vpop.f32.mrf.mxu2  ;;  %v755_v43 = vadd.f32 %v736_v41, %v626_v38 }
 0x177   : > { %v751_v45 = vadd.f32 %v726_v42, %v622_v40 }
 0x178   : > { %771 = vst [vmem:[%s1907_s19 + $0x70] sm:$0xff] %v755_v43  ;;  %v706_v46 = vpop.f32.mrf.mxu0 }
 0x179   : > { %767 = vst [vmem:[%s1907_s19 + $0x50] sm:$0xff] %v751_v45  ;;  %v743_v47 = vadd.f32 %v706_v46, %v614_v44 }
 0x17b   : > { %759 = vst [vmem:[%s1907_s19 + $0x10] sm:$0xff] %v743_v47 }
 0x17d   : > { %v738_v51 = vpop.f32.mrf.mxu3 }
 0x17e   : > { %v728_v52 = vpop.f32.mrf.mxu2  ;;  %v756_v53 = vadd.f32 %v738_v51, %v627_v48 }
 0x17f   : > { %v752_v56 = vadd.f32 %v728_v52, %v623_v50 }
 0x180   : > { %772 = vst [vmem:[%s1907_s19 + $0x78] sm:$0xff] %v756_v53  ;;  %v708_v57 = vpop.f32.mrf.mxu0  ;;  %v716_v58 = vpop.f32.mrf.mxu1 }
 0x181   : > { %768 = vst [vmem:[%s1907_s19 + $0x58] sm:$0xff] %v752_v56  ;;  %v744_v59 = vadd.f32 %v708_v57, %v615_v54  ;;  %v747_v60 = vadd.f32 %v716_v58, %v618_v55 }
 0x183   : > { %760 = vst [vmem:[%s1907_s19 + $0x18] sm:$0xff] %v744_v59 }
 0x184   : > { %763 = vst [vmem:[%s1907_s19 + $0x30] sm:$0xff] %v747_v60 }
 0x187   : > { %776 = sbr.rel (%p1387_p8) target bundleno = 593 (0x251), region = 82 }
 0x188   : > { %v718_v62 = vpop.f32.mrf.mxu1 }
 0x189   : > { %v748_v1 = vadd.f32 %v718_v62, %v619_v61 }
 0x18b   : > { %764 = vst [vmem:[%s1907_s19 + $0x38] sm:$0xff] %v748_v1 }
 0x18c   : > { %v781_v2 = vld [vmem:[%s1907_s19 + $0x20] sm:$0xff]  ;;  %v2037_v3 = vld [vmem:[%s1907_s19 + $0x10] sm:$0xff]  ;;  %v1752_v5 = vmov 32   ;;  %v2045_v39 = vld [vmem:[%s1907_s19 + $0x28] sm:$0xff] }
 0x18d   : > { %v2040_v4 = vld [vmem:[%s1907_s19] sm:$0xff]  ;;  %1573 = vset.pattern.permute.xlu2 %v1752_v5  ;;  %1572 = vset.pattern.permute.xlu1 %v1752_v5  ;;  %v2048_v6 = vld [vmem:[%s1907_s19 + $0x18] sm:$0xff]  ;;  %v2051_v7 = vld [vmem:[%s1907_s19 + $0x8] sm:$0xff] }
 0x18e   : > { %1571 = vset.pattern.permute.xlu0 %v1752_v5  ;;  %815 = vperm.xlu2 %1573, %v781_v2   ;;  %v2057_v27 = vld [vmem:[%s1907_s19 + $0x40] sm:$0xff]  ;;  %v2063_v9 = vld [vmem:[%s1907_s19 + $0x30] sm:$0xff]  ;;  %v2069_v10 = vld [vmem:[%s1907_s19 + $0x58] sm:$0xff] }
 0x18f   : > { %805 = vperm.xlu1 %1572, %v2037_v3   ;;  %795 = vperm.xlu0 %1571, %v2040_v4   ;;  %v2072_v11 = vld [vmem:[%s1907_s19 + $0x50] sm:$0xff]  ;;  %v2075_v12 = vld [vmem:[%s1907_s19 + $0x48] sm:$0xff]  ;;  %v2087_v15 = vld [vmem:[%s1907_s19 + $0x60] sm:$0xff] }
 0x190   : > { %v2081_v13 = vld [vmem:[%s1907_s19 + $0x70] sm:$0xff]  ;;  %v2084_v14 = vld [vmem:[%s1907_s19 + $0x68] sm:$0xff]  ;;  %v2093_v16 = vld [vmem:[%s1907_s19 + $0x78] sm:$0xff] }
 0x192   : > { %v2060_v8 = vld [vmem:[%s1907_s19 + $0x38] sm:$0xff] }
 0x196   : > { %820 = vperm.xlu2 %1573, %v2045_v39  }
 0x197   : > { %810 = vperm.xlu1 %1572, %v2048_v6   ;;  %800 = vperm.xlu0 %1571, %v2051_v7  }
 0x19e   : > { %835 = vperm.xlu2 %1573, %v2057_v27  }
 0x19f   : > { %830 = vperm.xlu1 %1572, %v2060_v8   ;;  %825 = vperm.xlu0 %1571, %v2063_v9  }
 0x1a6   : > { %850 = vperm.xlu2 %1573, %v2069_v10  }
 0x1a7   : > { %845 = vperm.xlu1 %1572, %v2072_v11   ;;  %840 = vperm.xlu0 %1571, %v2075_v12  }
 0x1ae   : > { %865 = vperm.xlu2 %1573, %v2081_v13  }
 0x1af   : > { %860 = vperm.xlu1 %1572, %v2084_v14   ;;  %855 = vperm.xlu0 %1571, %v2087_v15  }
 0x1b7   : > { %870 = vperm.xlu0 %1571, %v2093_v16  }
 0x1e8   : > { %v816_v17 = vpop.permute.xlu2 %815 }
 0x1e9   : > { %1574 = vrcp.f32 %v816_v17  ;;  %v944_v20 = vand.u32 2147483648, %v816_v17  ;;  %vm938_vm0 = vweird.f32 %v816_v17  ;;  %v942_v22 = vand.u32 2147483647, %v816_v17 }
 0x1eb   : > { %v945_v24 = vor.u32 1.1754944e-38, %v944_v20  ;;  %vm943_vm3 = vcmp.eq.f32.partialorder %v942_v22, 8.507059e+37 }
 0x1ef   : > { %v1575_v49 = vpop.eup %1574 }
 0x1f0   : > { %v934_v18 = vmul.f32 %v1575_v49, %v816_v17  ;;  %v821_v19 = vpop.permute.xlu2 %820  ;;  %vm939_vm1 = vweird.f32 %v1575_v49 }
 0x1f1   : > { %1576 = vrcp.f32 %v821_v19  ;;  %vm940_vm2 = vmor %vm938_vm0, %vm939_vm1  ;;  %vm953_vm4 = vweird.f32 %v821_v19  ;;  %v959_v31 = vand.u32 2147483648, %v821_v19  ;;  %v957_v33 = vand.u32 2147483647, %v821_v19 }
 0x1f2   : > { %v935_v21 = vsub.f32 1.0, %v934_v18 }
 0x1f3   : > { %v960_v36 = vor.u32 1.1754944e-38, %v959_v31  ;;  %vm958_vm7 = vcmp.eq.f32.partialorder %v957_v33, 8.507059e+37 }
 0x1f4   : > { %v936_v23 = vmul.f32 %v1575_v49, %v935_v21 }
 0x1f6   : > { %v937_v25 = vadd.f32 %v1575_v49, %v936_v23 }
 0x1f7   : > { %v1577_v63 = vpop.eup %1576 }
 0x1f8   : > { %v941_v26 = vsel %vm940_vm2, %v1575_v49, %v937_v25  ;;  %v949_v28 = vmul.f32 %v1577_v63, %v821_v19  ;;  %v836_v29 = vpop.permute.xlu2 %835  ;;  %vm954_vm5 = vweird.f32 %v1577_v63 }
 0x1f9   : > { %v946_v30 = vsel %vm943_vm3, %v945_v24, %v941_v26  ;;  %1578 = vrcp.f32 %v836_v29  ;;  %vm955_vm6 = vmor %vm953_vm4, %vm954_vm5  ;;  %vm998_vm8 = vweird.f32 %v836_v29  ;;  %v1002_v44 = vand.u32 2147483647, %v836_v29 }
 0x1fa   : > { %v947_v32 = vmul.f32 %v946_v30, %v781_v2  ;;  %v950_v0 = vsub.f32 1.0, %v949_v28  ;;  %v1004_v45 = vand.u32 2147483648, %v836_v29 }
 0x1fb   : > { %vm1003_vm12 = vcmp.eq.f32.partialorder %v1002_v44, 8.507059e+37 }
 0x1fc   : > { %v1137_v34 = vmul.f32 1.442695, %v947_v32  ;;  %v951_v35 = vmul.f32 %v1577_v63, %v950_v0  ;;  %vm1117_vm10 = vcmp.gt.f32.partialorder %v947_v32, 0.0  ;;  %v1005_v58 = vor.u32 1.1754944e-38, %v1004_v45 }
 0x1fe   : > { %1580 = vpow2.f32 %v1137_v34  ;;  %v952_v37 = vadd.f32 %v1577_v63, %v951_v35 }
 0x1ff   : > { %v1579_v38 = vpop.eup %1578 }
 0x200   : > { %v956_v40 = vsel %vm955_vm6, %v1577_v63, %v952_v37  ;;  %v994_v41 = vmul.f32 %v1579_v38, %v836_v29  ;;  %v2096_v42 = vpop.permute.xlu2 %850  ;;  %vm999_vm9 = vweird.f32 %v1579_v38 }
 0x201   : > { %v961_v43 = vsel %vm958_vm7, %v960_v36, %v956_v40  ;;  %1582 = vrcp.f32 %v2096_v42  ;;  %v2099_v46 = vpop.permute.xlu1 %805  ;;  %v2101_v47 = vpop.permute.xlu0 %795  ;;  %v1047_v54 = vand.u32 2147483647, %v2096_v42  ;;  %v1049_v55 = vand.u32 2147483648, %v2096_v42  ;;  %vm2108_vm11 = vmor %vm998_vm8, %vm999_vm9 }
 0x202   : > { %v962_v48 = vmul.f32 %v961_v43, %v2045_v39  ;;  %v995_v50 = vsub.f32 1.0, %v994_v41  ;;  %1584 = vrcp.f32 %v2099_v46  ;;  %v912_v59 = vand.u32 2147483647, %v2099_v46 }
 0x203   : > { %1586 = vrcp.f32 %v2101_v47  ;;  %v914_v61 = vand.u32 2147483648, %v2099_v46  ;;  %vm1043_vm14 = vweird.f32 %v2096_v42  ;;  %vm908_vm15 = vweird.f32 %v2099_v46 }
 0x204   : > { %v1581_v51 = vpop.eup %1580  ;;  %v1139_v52 = vmul.f32 1.442695, %v962_v48  ;;  %v996_v53 = vmul.f32 %v1579_v38, %v995_v50  ;;  %vm1118_vm13 = vcmp.gt.f32.partialorder %v962_v48, 0.0  ;;  %vm2122_vm0 = vcmp.eq.f32.partialorder %v1047_v54, 8.507059e+37 }
 0x205   : > { %v1392_v56 = vadd.f32 -1.0, %v1581_v51  ;;  %v1050_v49 = vor.u32 1.1754944e-38, %v1049_v55  ;;  %v882_v18 = vand.u32 2147483647, %v2101_v47  ;;  %vm2130_vm1 = vcmp.eq.f32.partialorder %v912_v59, 8.507059e+37 }
 0x206   : > { %1588 = vpow2.f32 %v1139_v52  ;;  %v997_v60 = vadd.f32 %v1579_v38, %v996_v53  ;;  %v884_v23 = vand.u32 2147483648, %v2101_v47  ;;  %v915_v28 = vor.u32 1.1754944e-38, %v914_v61 }
 0x207   : > { %v1583_v62 = vpop.eup %1582  ;;  %v1181_v1 = vsel %vm1117_vm10, %v947_v32, %v1392_v56  ;;  %vm878_vm3 = vweird.f32 %v2101_v47  ;;  %vm2147_vm4 = vcmp.eq.f32.partialorder %v882_v18, 8.507059e+37 }
 0x208   : > { %v1585_v2 = vpop.eup %1584  ;;  %1197 = vst [vmem:[%s1907_s19 + $0x20] sm:$0xff] %v1181_v1  ;;  %v1001_v5 = vsel %vm2108_vm11, %v1579_v38, %v997_v60  ;;  %v1039_v39 = vmul.f32 %v1583_v62, %v2096_v42  ;;  %v2127_v19 = vpop.permute.xlu2 %865  ;;  %vm1044_vm2 = vweird.f32 %v1583_v62  ;;  %v885_v36 = vor.u32 1.1754944e-38, %v884_v23 }
 0x209   : > { %v1006_v20 = vsel %vm1003_vm12, %v1005_v58, %v1001_v5  ;;  %v904_v21 = vmul.f32 %v1585_v2, %v2099_v46  ;;  %v2135_v24 = vpop.permute.xlu1 %810  ;;  %v2137_v25 = vpop.permute.xlu0 %800  ;;  %1590 = vrcp.f32 %v2127_v19  ;;  %vm909_vm5 = vweird.f32 %v1585_v2  ;;  %vm1045_vm6 = vmor %vm1043_vm14, %vm1044_vm2 }
 0x20a   : > { %v2140_v63 = vmul.f32 %v1006_v20, %v2057_v27  ;;  %v1040_v26 = vsub.f32 1.0, %v1039_v39  ;;  %v1587_v29 = vpop.eup %1586  ;;  %1592 = vrcp.f32 %v2135_v24  ;;  %v1092_v40 = vand.u32 2147483647, %v2127_v19  ;;  %vm910_vm8 = vmor %vm908_vm15, %vm909_vm5 }
 0x20b   : > { %v905_v30 = vsub.f32 1.0, %v904_v21  ;;  %v874_v33 = vmul.f32 %v1587_v29, %v2101_v47  ;;  %vm1088_vm7 = vweird.f32 %v2127_v19  ;;  %v1094_v44 = vand.u32 2147483648, %v2127_v19 }
 0x20c   : > { %v1589_v31 = vpop.eup %1588  ;;  %v1145_v32 = vmul.f32 1.442695, %v2140_v63  ;;  %v1041_v0 = vmul.f32 %v1583_v62, %v1040_v26  ;;  %vm879_vm9 = vweird.f32 %v1587_v29  ;;  %vm1121_vm10 = vcmp.gt.f32.partialorder %v2140_v63, 0.0 }
 0x20d   : > { %v1393_v34 = vadd.f32 -1.0, %v1589_v31  ;;  %v906_v35 = vmul.f32 %v1585_v2, %v905_v30  ;;  %v875_v38 = vsub.f32 1.0, %v874_v33  ;;  %vm2173_vm11 = vcmp.eq.f32.partialorder %v1092_v40, 8.507059e+37  ;;  %vm880_vm12 = vmor %vm878_vm3, %vm879_vm9 }
 0x20e   : > { %1594 = vpow2.f32 %v1145_v32  ;;  %v1042_v37 = vadd.f32 %v1583_v62, %v1041_v0  ;;  %v927_v61 = vand.u32 2147483647, %v2135_v24  ;;  %v1095_v23 = vor.u32 1.1754944e-38, %v1094_v44 }
 0x20f   : > { %v1182_v41 = vsel %vm1118_vm13, %v962_v48, %v1393_v34  ;;  %v907_v43 = vadd.f32 %v1585_v2, %v906_v35  ;;  %v1591_v45 = vpop.eup %1590  ;;  %v876_v51 = vmul.f32 %v1587_v29, %v875_v38  ;;  %1596 = vrcp.f32 %v2137_v25 }
 0x210   : > { %1198 = vst [vmem:[%s1907_s19 + $0x28] sm:$0xff] %v1182_v41  ;;  %v1046_v50 = vsel %vm1045_vm6, %v1583_v62, %v1042_v37  ;;  %v1593_v48 = vpop.eup %1592  ;;  %v1084_v53 = vmul.f32 %v1591_v45, %v2127_v19  ;;  %v929_v62 = vand.u32 2147483648, %v2135_v24  ;;  %vm1089_vm13 = vweird.f32 %v1591_v45 }
 0x211   : > { %v1051_v42 = vsel %vm2122_vm0, %v1050_v49, %v1046_v50  ;;  %v911_v52 = vsel %vm910_vm8, %v1585_v2, %v907_v43  ;;  %v2166_v54 = vpop.permute.xlu1 %830  ;;  %v877_v56 = vadd.f32 %v1587_v29, %v876_v51  ;;  %v919_v58 = vmul.f32 %v1593_v48, %v2135_v24  ;;  %v2178_v59 = vpop.permute.xlu0 %825  ;;  %vm1090_vm15 = vmor %vm1088_vm7, %vm1089_vm13 }
 0x212   : > { %v2169_v55 = vmul.f32 %v1051_v42, %v2069_v10  ;;  %v916_v46 = vsel %vm2130_vm1, %v915_v28, %v911_v52  ;;  %v1085_v10 = vsub.f32 1.0, %v1084_v53  ;;  %vm924_vm14 = vweird.f32 %v1593_v48 }
 0x213   : > { %v2181_v60 = vmul.f32 %v916_v46, %v2037_v3  ;;  %v881_v5 = vsel %vm880_vm12, %v1587_v29, %v877_v56  ;;  %v920_v39 = vsub.f32 1.0, %v919_v58  ;;  %vm923_vm0 = vweird.f32 %v2135_v24 }
 0x214   : > { %v1595_v1 = vpop.eup %1594  ;;  %v1151_v2 = vmul.f32 1.442695, %v2169_v55  ;;  %v886_v49 = vsel %vm2147_vm4, %v885_v36, %v881_v5  ;;  %v1086_v20 = vmul.f32 %v1591_v45, %v1085_v10  ;;  %vm925_vm1 = vmor %vm923_vm0, %vm924_vm14  ;;  %vm928_vm2 = vcmp.eq.f32.partialorder %v927_v61, 8.507059e+37 }
 0x215   : > { %v1396_v17 = vadd.f32 -1.0, %v1595_v1  ;;  %v1133_v3 = vmul.f32 1.442695, %v2181_v60  ;;  %v1597_v47 = vpop.eup %1596  ;;  %v887_v18 = vmul.f32 %v886_v49, %v2040_v4  ;;  %v921_v21 = vmul.f32 %v1593_v48, %v920_v39 }
 0x216   : > { %1598 = vpow2.f32 %v1151_v2  ;;  %v889_v26 = vmul.f32 %v1597_v47, %v2137_v25  ;;  %v1087_v29 = vadd.f32 %v1591_v45, %v1086_v20  ;;  %v930_v4 = vor.u32 1.1754944e-38, %v929_v62 }
 0x217   : > { %v1185_v22 = vsel %vm1121_vm10, %v2140_v63, %v1396_v17  ;;  %1600 = vpow2.f32 %v1133_v3  ;;  %v1129_v28 = vmul.f32 1.442695, %v887_v18  ;;  %v922_v30 = vadd.f32 %v1593_v48, %v921_v21 }
 0x218   : > { %1201 = vst [vmem:[%s1907_s19 + $0x40] sm:$0xff] %v1185_v22  ;;  %v890_v31 = vsub.f32 1.0, %v889_v26  ;;  %vm894_vm3 = vweird.f32 %v1597_v47  ;;  %v1091_v63 = vsel %vm1090_vm15, %v1591_v45, %v1087_v29  ;;  %v899_v0 = vand.u32 2147483648, %v2137_v25 }
 0x219   : > { %1602 = vpow2.f32 %v1129_v28  ;;  %v926_v32 = vsel %vm925_vm1, %v1593_v48, %v922_v30  ;;  %v1096_v33 = vsel %vm2173_vm11, %v1095_v23, %v1091_v63  ;;  %v897_v34 = vand.u32 2147483647, %v2137_v25  ;;  %v2207_v35 = vpop.permute.xlu1 %845  ;;  %v2214_v38 = vpop.permute.xlu0 %840 }
 0x21a   : > { %v931_v27 = vsel %vm928_vm2, %v930_v4, %v926_v32  ;;  %v891_v19 = vmul.f32 %v1597_v47, %v890_v31  ;;  %v1097_v36 = vmul.f32 %v1096_v33, %v2081_v13  ;;  %1604 = vrcp.f32 %v2166_v54 }
 0x21b   : > { %v2211_v37 = vmul.f32 %v931_v27, %v2048_v6  ;;  %vm1124_vm4 = vcmp.gt.f32.partialorder %v2169_v55, 0.0  ;;  %vm893_vm5 = vweird.f32 %v2137_v25  ;;  %vm1115_vm6 = vcmp.gt.f32.partialorder %v2181_v60, 0.0 }
 0x21c   : > { %v1599_v24 = vpop.eup %1598  ;;  %v892_v43 = vadd.f32 %v1597_v47, %v891_v19  ;;  %v1157_v13 = vmul.f32 1.442695, %v1097_v36  ;;  %vm895_vm7 = vmor %vm893_vm5, %vm894_vm3  ;;  %v900_v6 = vor.u32 1.1754944e-38, %v899_v0  ;;  %vm898_vm8 = vcmp.eq.f32.partialorder %v897_v34, 8.507059e+37 }
 0x21d   : > { %v1601_v40 = vpop.eup %1600  ;;  %v1399_v41 = vadd.f32 -1.0, %v1599_v24  ;;  %v1135_v50 = vmul.f32 1.442695, %v2211_v37  ;;  %vm1113_vm9 = vcmp.gt.f32.partialorder %v887_v18, 0.0  ;;  %vm983_vm10 = vweird.f32 %v2166_v54 }
 0x21e   : > { %v1390_v44 = vadd.f32 -1.0, %v1601_v40  ;;  %v896_v51 = vsel %vm895_vm7, %v1597_v47, %v892_v43  ;;  %1606 = vpow2.f32 %v1157_v13  ;;  %vm1127_vm11 = vcmp.gt.f32.partialorder %v1097_v36, 0.0 }
 0x21f   : > { %v1188_v45 = vsel %vm1124_vm4, %v2169_v55, %v1399_v41  ;;  %v1603_v48 = vpop.eup %1602  ;;  %v901_v25 = vsel %vm898_vm8, %v900_v6, %v896_v51  ;;  %1608 = vpow2.f32 %v1135_v50  ;;  %v987_v55 = vand.u32 2147483647, %v2166_v54 }
 0x220   : > { %1204 = vst [vmem:[%s1907_s19 + $0x58] sm:$0xff] %v1188_v45  ;;  %v1179_v42 = vsel %vm1115_vm6, %v2181_v60, %v1390_v44  ;;  %v1388_v52 = vadd.f32 -1.0, %v1603_v48  ;;  %v2226_v53 = vmul.f32 %v901_v25, %v2051_v7  ;;  %v1605_v46 = vpop.eup %1604  ;;  %1610 = vrcp.f32 %v2178_v59 }
 0x221   : > { %1195 = vst [vmem:[%s1907_s19 + $0x10] sm:$0xff] %v1179_v42  ;;  %v979_v58 = vmul.f32 %v1605_v46, %v2166_v54  ;;  %v989_v60 = vand.u32 2147483648, %v2166_v54  ;;  %1612 = vrcp.f32 %v2207_v35  ;;  %v972_v10 = vand.u32 2147483647, %v2178_v59  ;;  %v2237_v61 = vpop.permute.xlu1 %860  ;;  %v2246_v5 = vpop.permute.xlu0 %855 }
 0x222   : > { %v1177_v56 = vsel %vm1113_vm9, %v887_v18, %v1388_v52  ;;  %v1131_v57 = vmul.f32 1.442695, %v2226_v53  ;;  %vm1116_vm12 = vcmp.gt.f32.partialorder %v2211_v37, 0.0  ;;  %vm2240_vm13 = vcmp.eq.f32.partialorder %v987_v55, 8.507059e+37 }
 0x223   : > { %1193 = vst [vmem:[%s1907_s19] sm:$0xff] %v1177_v56  ;;  %v980_v7 = vsub.f32 1.0, %v979_v58  ;;  %v974_v2 = vand.u32 2147483648, %v2178_v59  ;;  %vm984_vm14 = vweird.f32 %v1605_v46  ;;  %v990_v49 = vor.u32 1.1754944e-38, %v989_v60 }
 0x224   : > { %1614 = vpow2.f32 %v1131_v57  ;;  %v1607_v62 = vpop.eup %1606  ;;  %vm968_vm15 = vweird.f32 %v2178_v59  ;;  %vm1114_vm0 = vcmp.gt.f32.partialorder %v2226_v53, 0.0  ;;  %v1032_v20 = vand.u32 2147483647, %v2207_v35  ;;  %vm985_vm2 = vmor %vm983_vm10, %vm984_vm14 }
 0x225   : > { %1616 = vrcp.f32 %v2214_v38  ;;  %v1609_v39 = vpop.eup %1608  ;;  %v1402_v17 = vadd.f32 -1.0, %v1607_v62  ;;  %v981_v3 = vmul.f32 %v1605_v46, %v980_v7  ;;  %vm2254_vm1 = vcmp.eq.f32.partialorder %v972_v10, 8.507059e+37 }
 0x226   : > { %v1611_v47 = vpop.eup %1610  ;;  %v1391_v18 = vadd.f32 -1.0, %v1609_v39  ;;  %1618 = vrcp.f32 %v2237_v61  ;;  %v975_v30 = vor.u32 1.1754944e-38, %v974_v2  ;;  %vm1028_vm3 = vweird.f32 %v2207_v35 }
 0x227   : > { %v1191_v21 = vsel %vm1127_vm11, %v1097_v36, %v1402_v17  ;;  %v982_v22 = vadd.f32 %v1605_v46, %v981_v3  ;;  %v964_v23 = vmul.f32 %v1611_v47, %v2178_v59  ;;  %v1613_v28 = vpop.eup %1612  ;;  %v1034_v4 = vand.u32 2147483648, %v2207_v35 }
 0x228   : > { %1207 = vst [vmem:[%s1907_s19 + $0x70] sm:$0xff] %v1191_v21  ;;  %v1180_v29 = vsel %vm1116_vm12, %v2211_v37, %v1391_v18  ;;  %v1024_v0 = vmul.f32 %v1613_v28, %v2207_v35  ;;  %v1017_v33 = vand.u32 2147483647, %v2214_v38  ;;  %vm969_vm4 = vweird.f32 %v1611_v47 }
 0x229   : > { %1196 = vst [vmem:[%s1907_s19 + $0x18] sm:$0xff] %v1180_v29  ;;  %v986_v63 = vsel %vm985_vm2, %v1605_v46, %v982_v22  ;;  %v965_v32 = vsub.f32 1.0, %v964_v23  ;;  %vm2272_vm5 = vcmp.eq.f32.partialorder %v1032_v20, 8.507059e+37  ;;  %vm1013_vm6 = vweird.f32 %v2214_v38  ;;  %vm970_vm8 = vmor %vm968_vm15, %vm969_vm4  ;;  %v2297_v25 = vpop.permute.xlu0 %870 }
 0x22a   : > { %v1615_v31 = vpop.eup %1614  ;;  %v991_v54 = vsel %vm2240_vm13, %v990_v49, %v986_v63  ;;  %v1025_v37 = vsub.f32 1.0, %v1024_v0  ;;  %v1035_v44 = vor.u32 1.1754944e-38, %v1034_v4  ;;  %v1019_v13 = vand.u32 2147483648, %v2214_v38 }
 0x22b   : > { %v1617_v27 = vpop.eup %1616  ;;  %v1389_v19 = vadd.f32 -1.0, %v1615_v31  ;;  %v2278_v24 = vmul.f32 %v991_v54, %v2060_v8  ;;  %v966_v36 = vmul.f32 %v1611_v47, %v965_v32  ;;  %1620 = vrcp.f32 %v2246_v5 }
 0x22c   : > { %v1009_v40 = vmul.f32 %v1617_v27, %v2214_v38  ;;  %v1619_v41 = vpop.eup %1618  ;;  %v1026_v8 = vmul.f32 %v1613_v28, %v1025_v37  ;;  %vm1029_vm7 = vweird.f32 %v1613_v28  ;;  %vm2291_vm9 = vcmp.eq.f32.partialorder %v1017_v33, 8.507059e+37 }
 0x22d   : > { %v1178_v43 = vsel %vm1114_vm0, %v2226_v53, %v1389_v19  ;;  %v1143_v6 = vmul.f32 1.442695, %v2278_v24  ;;  %v967_v45 = vadd.f32 %v1611_v47, %v966_v36  ;;  %v1069_v48 = vmul.f32 %v1619_v41, %v2237_v61  ;;  %vm1030_vm10 = vmor %vm1028_vm3, %vm1029_vm7 }
 0x22e   : > { %1194 = vst [vmem:[%s1907_s19 + $0x8] sm:$0xff] %v1178_v43  ;;  %v1010_v50 = vsub.f32 1.0, %v1009_v40  ;;  %v1077_v42 = vand.u32 2147483647, %v2237_v61  ;;  %v1027_v53 = vadd.f32 %v1613_v28, %v1026_v8  ;;  %v1079_v46 = vand.u32 2147483648, %v2237_v61 }
 0x22f   : > { %1622 = vpow2.f32 %v1143_v6  ;;  %v971_v52 = vsel %vm970_vm8, %v1611_v47, %v967_v45  ;;  %vm1014_vm11 = vweird.f32 %v1617_v27  ;;  %v1070_v56 = vsub.f32 1.0, %v1069_v48 }
 0x230   : > { %v976_v59 = vsel %vm2254_vm1, %v975_v30, %v971_v52  ;;  %v1011_v55 = vmul.f32 %v1617_v27, %v1010_v50  ;;  %v1031_v58 = vsel %vm1030_vm10, %v1613_v28, %v1027_v53  ;;  %v1020_v60 = vor.u32 1.1754944e-38, %v1019_v13  ;;  %vm1015_vm13 = vmor %vm1013_vm6, %vm1014_vm11 }
 0x231   : > { %v977_v57 = vmul.f32 %v976_v59, %v2063_v9  ;;  %1624 = vrcp.f32 %v2297_v25  ;;  %v1621_v7 = vpop.eup %1620  ;;  %v1036_v10 = vsel %vm2272_vm5, %v1035_v44, %v1031_v58  ;;  %v1071_v1 = vmul.f32 %v1619_v41, %v1070_v56 }
 0x232   : > { %v1012_v62 = vadd.f32 %v1617_v27, %v1011_v55  ;;  %vm1074_vm12 = vweird.f32 %v1619_v41  ;;  %v1037_v35 = vmul.f32 %v1036_v10, %v2072_v11  ;;  %vm1073_vm14 = vweird.f32 %v2237_v61 }
 0x233   : > { %v1141_v2 = vmul.f32 1.442695, %v977_v57  ;;  %v1054_v9 = vmul.f32 %v1621_v7, %v2246_v5  ;;  %v1072_v17 = vadd.f32 %v1619_v41, %v1071_v1  ;;  %vm1078_vm15 = vcmp.eq.f32.partialorder %v1077_v42, 8.507059e+37  ;;  %vm1075_vm1 = vmor %vm1073_vm14, %vm1074_vm12 }
 0x234   : > { %v1016_v39 = vsel %vm1015_vm13, %v1617_v27, %v1012_v62  ;;  %v1080_v3 = vor.u32 1.1754944e-38, %v1079_v46  ;;  %vm1120_vm0 = vcmp.gt.f32.partialorder %v2278_v24, 0.0  ;;  %v1149_v47 = vmul.f32 1.442695, %v1037_v35 }
 0x235   : > { %v1623_v49 = vpop.eup %1622  ;;  %1626 = vpow2.f32 %v1141_v2  ;;  %v1021_v11 = vsel %vm2291_vm9, %v1020_v60, %v1016_v39  ;;  %v1076_v18 = vsel %vm1075_vm1, %v1619_v41, %v1072_v17  ;;  %v1055_v20 = vsub.f32 1.0, %v1054_v9 }
 0x236   : > { %v1395_v38 = vadd.f32 -1.0, %v1623_v49  ;;  %v1022_v61 = vmul.f32 %v1021_v11, %v2075_v12  ;;  %1628 = vpow2.f32 %v1149_v47  ;;  %v1081_v22 = vsel %vm1078_vm15, %v1080_v3, %v1076_v18 }
 0x237   : > { %v1625_v21 = vpop.eup %1624  ;;  %v1062_v23 = vand.u32 2147483647, %v2246_v5  ;;  %v1064_v26 = vand.u32 2147483648, %v2246_v5  ;;  %v1082_v30 = vmul.f32 %v1081_v22, %v2084_v14  ;;  %v1056_v4 = vmul.f32 %v1621_v7, %v1055_v20 }
 0x238   : > { %v1184_v28 = vsel %vm1120_vm0, %v2278_v24, %v1395_v38  ;;  %v1147_v29 = vmul.f32 1.442695, %v1022_v61  ;;  %vm1059_vm2 = vweird.f32 %v1621_v7  ;;  %v1099_v31 = vmul.f32 %v1625_v21, %v2297_v25 }
 0x239   : > { %1200 = vst [vmem:[%s1907_s19 + $0x38] sm:$0xff] %v1184_v28  ;;  %v1155_v12 = vmul.f32 1.442695, %v1082_v30  ;;  %vm1058_vm3 = vweird.f32 %v2246_v5  ;;  %v1057_v32 = vadd.f32 %v1621_v7, %v1056_v4  ;;  %vm1063_vm4 = vcmp.eq.f32.partialorder %v1062_v23, 8.507059e+37 }
 0x23a   : > { %1630 = vpow2.f32 %v1147_v29  ;;  %v1065_v0 = vor.u32 1.1754944e-38, %v1064_v26  ;;  %v1100_v33 = vsub.f32 1.0, %v1099_v31  ;;  %vm1119_vm5 = vcmp.gt.f32.partialorder %v977_v57, 0.0  ;;  %vm1060_vm6 = vmor %vm1058_vm3, %vm1059_vm2 }
 0x23b   : > { %v1627_v63 = vpop.eup %1626  ;;  %1632 = vpow2.f32 %v1155_v12  ;;  %v1109_v14 = vand.u32 2147483648, %v2297_v25  ;;  %v1061_v54 = vsel %vm1060_vm6, %v1621_v7, %v1057_v32  ;;  %vm1104_vm7 = vweird.f32 %v1625_v21 }
 0x23c   : > { %v1394_v27 = vadd.f32 -1.0, %v1627_v63  ;;  %v1629_v19 = vpop.eup %1628  ;;  %v1101_v34 = vmul.f32 %v1625_v21, %v1100_v33  ;;  %v1107_v24 = vand.u32 2147483647, %v2297_v25  ;;  %v1066_v37 = vsel %vm1063_vm4, %v1065_v0, %v1061_v54 }
 0x23d   : > { %v1398_v36 = vadd.f32 -1.0, %v1629_v19  ;;  %vm1123_vm8 = vcmp.gt.f32.partialorder %v1037_v35, 0.0  ;;  %v1067_v40 = vmul.f32 %v1066_v37, %v2087_v15  ;;  %vm1103_vm9 = vweird.f32 %v2297_v25 }
 0x23e   : > { %v1183_v5 = vsel %vm1119_vm5, %v977_v57, %v1394_v27  ;;  %v1102_v41 = vadd.f32 %v1625_v21, %v1101_v34  ;;  %vm1105_vm10 = vmor %vm1103_vm9, %vm1104_vm7  ;;  %v1110_v13 = vor.u32 1.1754944e-38, %v1109_v14  ;;  %vm1108_vm11 = vcmp.eq.f32.partialorder %v1107_v24, 8.507059e+37 }
 0x23f   : > { %1199 = vst [vmem:[%s1907_s19 + $0x30] sm:$0xff] %v1183_v5  ;;  %v1187_v44 = vsel %vm1123_vm8, %v1037_v35, %v1398_v36  ;;  %v1153_v45 = vmul.f32 1.442695, %v1067_v40  ;;  %vm1122_vm12 = vcmp.gt.f32.partialorder %v1022_v61, 0.0  ;;  %vm1126_vm13 = vcmp.gt.f32.partialorder %v1082_v30, 0.0 }
 0x240   : > { %v1631_v43 = vpop.eup %1630  ;;  %1203 = vst [vmem:[%s1907_s19 + $0x50] sm:$0xff] %v1187_v44  ;;  %v1106_v8 = vsel %vm1105_vm10, %v1625_v21, %v1102_v41  ;;  %vm1125_vm14 = vcmp.gt.f32.partialorder %v1067_v40, 0.0 }
 0x241   : > { %v1397_v6 = vadd.f32 -1.0, %v1631_v43  ;;  %v1633_v50 = vpop.eup %1632  ;;  %v1111_v51 = vsel %vm1108_vm11, %v1110_v13, %v1106_v8  ;;  %1634 = vpow2.f32 %v1153_v45 }
 0x242   : > { %v1401_v15 = vadd.f32 -1.0, %v1633_v50  ;;  %v1112_v42 = vmul.f32 %v1111_v51, %v2093_v16 }
 0x243   : > { %v1186_v48 = vsel %vm1122_vm12, %v1022_v61, %v1397_v6 }
 0x244   : > { %1202 = vst [vmem:[%s1907_s19 + $0x48] sm:$0xff] %v1186_v48  ;;  %v1190_v25 = vsel %vm1126_vm13, %v1082_v30, %v1401_v15  ;;  %v1159_v52 = vmul.f32 1.442695, %v1112_v42  ;;  %vm1128_vm15 = vcmp.gt.f32.partialorder %v1112_v42, 0.0 }
 0x245   : > { %1206 = vst [vmem:[%s1907_s19 + $0x68] sm:$0xff] %v1190_v25 }
 0x246   : > { %1636 = vpow2.f32 %v1159_v52 }
 0x247   : > { %v1635_v53 = vpop.eup %1634 }
 0x248   : > { %v1400_v46 = vadd.f32 -1.0, %v1635_v53 }
 0x24a   : > { %v1189_v59 = vsel %vm1125_vm14, %v1067_v40, %v1400_v46 }
 0x24b   : > { %1205 = vst [vmem:[%s1907_s19 + $0x60] sm:$0xff] %v1189_v59 }
 0x24c   : > { %v1637_v55 = vpop.eup %1636 }
 0x24d   : > { %v1403_v56 = vadd.f32 -1.0, %v1637_v55 }
 0x24f   : > { %v1192_v57 = vsel %vm1128_vm15, %v1112_v42, %v1403_v56 }
 0x250   : > { %1208 = vst [vmem:[%s1907_s19 + $0x78] sm:$0xff] %v1192_v57 }
 0x251 PF: > { %s1418_s20 = sshll.u32 %s1736_s21, 7  ;;  %s1222_s12 = sshll.u32 %s1907_s19, 4  ;;  %s1223_s12 = int_to_ptr.vmem [resolvable:$true] %s1222_s12 }
 0x252   : > { %s1221_s28 = scalar_lea.hbm %s2391_s4, %s1418_s20  ;;  %s2427_s14 = sand.u32 1, %s1716_s16  }
 0x253   : > { %s1224_s13 = sshll.u32 %s1221_s28, 4  ;;  %s1210_s25 = scalar_lea.sflag [#allocation4], %s2427_s14  ;;  %s1225_s13 = int_to_ptr.hbm [resolvable:$true] %s1224_s13 }
 0x254   : > { %s1652_s26 = sshra.s32 %s1225_s13, 4  ;;  %s1658_s21 = scalar_lea.hbm %s2391_s4, 256  ;;  %s1653_s26 = int_to_ptr.hbm [resolvable:$true] %s1652_s26 }
 0x255   : > { %s1654_s30 = scalar_lea.hbm %s1653_s26, 128  ;;  %p1659_p13 = scmp.lt.s32.totalorder %s1653_s26, %s2391_s4 }
 0x256   : > { %p1655_p9 = scmp.ne.s32.totalorder %s1653_s26, %s1654_s30  ;;  %p1660_p0 = scmp.lt.s32.totalorder %s1658_s21, %s1654_s30 }
 0x258   : > { %p1656_p10 = pnand %p1655_p9, %p1852_p7  ;;  %p1661_p1 = por %p1660_p0, %p1659_p13 }
 0x25a   : > { %p1657_p11 = pneg %p1656_p10 }
 0x25c   : > { %p1662_p2 = pnand %p1661_p1, %p1657_p11 }
 0x25e   : > { %1665 = shalt.err (!%p1662_p2)
}
 0x25f   : > { %s1753_s19 = smov 128   ;;  %s1754_s18 = smov 8  }
 0x260   : > { %1443 = dma.vmem_to_hbm [thread:$0]  (%p1852_p7), %s1223_s12, 2048, %s1225_s13, %s1210_s25, %s1753_s19, %s1753_s19, %s1754_s18  }
 0x261 PF: > { %p1449_p3 = scmp.ge.s32.totalorder %s1748_s24, 2  ;;  %s1239_s5 = sand.u32 1, %s1712_s15  }
 0x262   : > { %s1240_s2 = scalar_lea.sflag [#allocation4], %s1239_s5 }
 0x263   : > { %p1446_p4 = pnand %p1449_p3, %p1860_p12 }
 0x265   : > { %p1447_p5 = pneg %p1446_p4 }
 0x267   : > { %1707 = dma.done.wait (%p1447_p5), %s1240_s2, 2048  }
 0x268   : > { %1709 = vsyncadd (%p1447_p5), %s1240_s2, 4294965248  ;;  %s17_s24 = sadd.s32 1, %s1748_s24   ;;  %s2428_s18 = sld [smem:[#allocation6_spill]] }
 0x269   : > { %p14_p6 = scmp.ge.s32.totalorder %s17_s24, 6   ;;  %s2429_s19 = sld [smem:[#allocation11_spill]] }
 0x26a   : > { %s2430_s20 = sld [smem:[#allocation7_spill]]  ;;  %s2434_s15 = smov %s1716_s16 }
 0x26b   : > { %s2431_s21 = sld [smem:[#allocation8_spill]]  ;;  %s2435_s16 = smov %s1720_s17 }
 0x26c   : > { %s2432_s22 = sld [smem:[#allocation9_spill]]  ;;  %s2436_s17 = smov %s1865_s11 }
 0x26d   : > { %s2433_s23 = sld [smem:[#allocation10_spill]]  ;;  %16 = sbr.rel (!%p14_p6) target bundleno = 8 (0x8), region = 131 }
 0x272   :  { %1246 = vsyncpa [#allocation4], 1 }
 0x273   :  { %1248 = vsyncpa [#allocation4 + $0x1], 1 }

</bundles_post_ra>
